<compile_context>
chip_gen: v6e
topology: v6e:2x2x1
jax: 0.10.0
libtpu: 0.0.40
codegen_flags: <defaults>
</compile_context>

<pallas_src>
import functools

import jax
import jax.numpy as jnp
from jax import lax
from jax.experimental import pallas as pl
from jax.experimental.pallas import tpu as pltpu

KH = 5          # kernel height
STRIDE_H = 2    # stride along H
PAD_H = 2       # padding along H
LEAKY_SLOPE = 0.2
BN_EPS = 1e-5


def _make_kernel(apply_act: bool):
    """Fused conv(5x1, stride 2) GEMM + BN affine + LeakyReLU kernel body."""

    def kernel(x_ref, w_ref, scale_ref, bias_ref, o_ref):
        # x_ref:     (1, KH*C_in, chunk)  bf16  (im2col columns, lane-dense)
        # w_ref:     (C_out, KH*C_in)     bf16  (conv weights, tap-major K)
        # scale_ref: (C_out, 1)           f32   BN scale (1.0 if last)
        # bias_ref:  (C_out, 1)           f32   folded conv-bias + BN shift
        # o_ref:     (1, C_out, chunk)    bf16  lane-dense output slab
        #
        # One MXU GEMM per grid step; f32 accumulation.  (At tiny channel
        # counts a VPU broadcast-FMA path would also work; jnp.dot keeps it
        # simple and the op is memory-bound regardless.)
        acc = jnp.dot(w_ref[...], x_ref[0],
                      preferred_element_type=jnp.float32)      # (C_out, chunk)

        # Single f32 epilogue over the whole tile.
        y = acc * scale_ref[...] + bias_ref[...]
        if apply_act:
            y = jnp.where(y > 0, y, LEAKY_SLOPE * y)
        o_ref[0] = y.astype(o_ref.dtype)

    return kernel


def conv2d_block(x, weight, conv_bias, gamma, beta, running_mean, running_var,
                 *, last: bool = False, lane_chunk_target: int = 1024):
    """Forward of the Conv2d module.  Returns bf16 (N, C_out, H_out, W).

    x:        (N, C_in, H, W) float32 (NCHW, same as PyTorch)
    weight:   (C_out, C_in, 5, 1) float32
    conv_bias, gamma, beta, running_mean, running_var: (C_out,) float32
    """
    n, c_in, h, w = x.shape
    c_out = weight.shape[0]
    h_out = (h + 2 * PAD_H - KH) // STRIDE_H + 1
    l = h_out * w                      # lane-dense output length per image
    kdim = KH * c_in                   # packed GEMM contraction dim

    # Lane chunking: multiple of 128, capped, padded to a whole number of
    # chunks.  Per-step VMEM ~ (kdim + c_out) * chunk * 2B * 2 buffers.
    l128 = ((l + 127) // 128) * 128
    chunk = max(128, (min(lane_chunk_target, l128) // 128) * 128)
    num_chunks = pl.cdiv(l, chunk)
    l_pad = num_chunks * chunk

    # Eval-mode BN folding -> f32 epilogue scale/bias (scale NOT baked into
    # the bf16 weights, to preserve precision).
    if last:
        scale = jnp.ones((c_out,), jnp.float32)
        bias = conv_bias.astype(jnp.float32)
    else:
        inv = gamma / jnp.sqrt(running_var + BN_EPS)
        scale = inv
        bias = beta + inv * (conv_bias - running_mean)
    scale2 = scale.reshape(c_out, 1).astype(jnp.float32)
    bias2 = bias.reshape(c_out, 1).astype(jnp.float32)

    # Weights: (C_out, C_in, KH, 1) -> (C_out, KH*C_in), tap-major along K.
    w_mat = jnp.transpose(weight[:, :, :, 0], (0, 2, 1)).reshape(c_out, kdim)
    w_mat = w_mat.astype(jnp.bfloat16)

    # im2col (one fused XLA pass over x): pad H, gather the 5 stride-2 tap
    # planes along the K dim, flatten (h_out, w) into a lane-dense last dim,
    # pad lanes to a multiple of the chunk, cast to bf16.
    x_padh = jnp.pad(x, ((0, 0), (0, 0), (PAD_H, PAD_H), (0, 0)))
    taps = [x_padh[:, :, k:k + STRIDE_H * h_out:STRIDE_H, :] for k in range(KH)]
    x_col = jnp.stack(taps, axis=1)                       # (N, KH, C_in, h_out, W)
    x_col = x_col.reshape(n, kdim, l)
    if l_pad != l:
        x_col = jnp.pad(x_col, ((0, 0), (0, 0), (0, l_pad - l)))
    x_col = x_col.astype(jnp.bfloat16)

    kernel = _make_kernel(apply_act=not last)

    out = pl.pallas_call(
        kernel,
        out_shape=jax.ShapeDtypeStruct((n, c_out, l_pad), jnp.bfloat16),
        grid=(n, num_chunks),
        in_specs=[
            pl.BlockSpec((1, kdim, chunk), lambda i, j: (i, 0, j)),
            pl.BlockSpec((c_out, kdim), lambda i, j: (0, 0)),
            pl.BlockSpec((c_out, 1), lambda i, j: (0, 0)),
            pl.BlockSpec((c_out, 1), lambda i, j: (0, 0)),
        ],
        out_specs=pl.BlockSpec((1, c_out, chunk), lambda i, j: (i, 0, j)),
        compiler_params=pltpu.CompilerParams(
            dimension_semantics=("parallel", "parallel")),
    )(x_col, w_mat, scale2, bias2)

    if l_pad != l:
        out = out[:, :, :l]
    return out.reshape(n, c_out, h_out, w)


def _reference(x, weight, conv_bias, gamma, beta, running_mean, running_var,
               *, last: bool = False):
    y = lax.conv_general_dilated(
        x, weight,
        window_strides=(STRIDE_H, 1),
        padding=((PAD_H, PAD_H), (0, 0)),
        dimension_numbers=("NCHW", "OIHW", "NCHW"),
    )
    y = y + conv_bias.reshape(1, -1, 1, 1)
    if not last:
        rm = running_mean.reshape(1, -1, 1, 1)
        rv = running_var.reshape(1, -1, 1, 1)
        g = gamma.reshape(1, -1, 1, 1)
        b = beta.reshape(1, -1, 1, 1)
        y = (y - rm) / jnp.sqrt(rv + BN_EPS) * g + b
        y = jnp.where(y > 0, y, LEAKY_SLOPE * y)
    return y


if __name__ == "__main__":
    key = jax.random.PRNGKey(0)
    k_x, k_w, k_b, k_g, k_be, k_rm, k_rv = jax.random.split(key, 7)

    N, C_IN, C_OUT, H, W = 2, 4, 8, 16, 16

    x = jax.random.normal(k_x, (N, C_IN, H, W), dtype=jnp.float32)
    weight = jax.random.normal(k_w, (C_OUT, C_IN, KH, 1), dtype=jnp.float32) * 0.1
    conv_bias = jax.random.normal(k_b, (C_OUT,), dtype=jnp.float32) * 0.1
    gamma = 1.0 + 0.1 * jax.random.normal(k_g, (C_OUT,), dtype=jnp.float32)
    beta = 0.1 * jax.random.normal(k_be, (C_OUT,), dtype=jnp.float32)
    running_mean = 0.1 * jax.random.normal(k_rm, (C_OUT,), dtype=jnp.float32)
    running_var = jnp.abs(jax.random.normal(k_rv, (C_OUT,), dtype=jnp.float32)) + 0.5

    for last in (False, True):
        fn = jax.jit(functools.partial(conv2d_block, last=last))
        out = jax.block_until_ready(fn(x, weight, conv_bias, gamma, beta,
                                       running_mean, running_var))
        ref = _reference(x, weight, conv_bias, gamma, beta,
                         running_mean, running_var, last=last)
        assert out.shape == (N, C_OUT, H // 2, W), out.shape
        assert out.dtype == jnp.bfloat16, out.dtype
        # bf16 MXU inputs + bf16 output with f32 accumulation -> loose
        # tolerance vs the f32 reference.
        err = float(jnp.max(jnp.abs(out.astype(jnp.float32) - ref)))
        assert err < 1e-1, (last, err)

    print("KERNEL_OK")
</pallas_src>

<mosaic_0001>
module attributes {stable_mosaic.version = 11 : i64} {
  func.func @kernel(%arg0: i32, %arg1: i32, %arg2: memref<1x20x128xbf16, #tpu.memory_space<vmem>>, %arg3: memref<8x20xbf16, #tpu.memory_space<vmem>>, %arg4: memref<8x1xf32, #tpu.memory_space<vmem>>, %arg5: memref<8x1xf32, #tpu.memory_space<vmem>>, %arg6: memref<1x8x128xbf16, #tpu.memory_space<vmem>>) attributes {dimension_semantics = [#tpu.dimension_semantics<parallel>, #tpu.dimension_semantics<parallel>], iteration_bounds = array<i64: 2, 1>, scalar_prefetch = 0 : i64, scratch_operands = 0 : i64, tpu.core_type = #tpu.core_type<tc>, window_params = [{transform_indices = @transform_0, window_bounds = array<i64: 1, 20, 128>}, {pipeline_mode = #tpu.pipeline_mode<synchronous>, transform_indices = @transform_1, window_bounds = array<i64: 8, 20>}, {pipeline_mode = #tpu.pipeline_mode<synchronous>, transform_indices = @transform_2, window_bounds = array<i64: 8, 1>}, {pipeline_mode = #tpu.pipeline_mode<synchronous>, transform_indices = @transform_3, window_bounds = array<i64: 8, 1>}, {transform_indices = @transform_4, window_bounds = array<i64: 1, 8, 128>}]} {
    %c0 = arith.constant 0 : index
    %c0_0 = arith.constant 0 : index
    %0 = vector.load %arg3[%c0, %c0_0] : memref<8x20xbf16, #tpu.memory_space<vmem>>, vector<8x20xbf16>
    %c0_1 = arith.constant 0 : index
    %c0_2 = arith.constant 0 : index
    %c0_3 = arith.constant 0 : index
    %1 = vector.load %arg2[%c0_1, %c0_2, %c0_3] : memref<1x20x128xbf16, #tpu.memory_space<vmem>>, vector<1x20x128xbf16>
    %2 = vector.shape_cast %1 : vector<1x20x128xbf16> to vector<20x128xbf16>
    %cst = arith.constant dense<0.000000e+00> : vector<8x128xf32>
    %3 = tpu.matmul %0, %2, %cst {dimension_numbers = #tpu.dot_dimension_numbers<[1], [0], [0], [1], [0, 0, 1, 1], [], []>} : vector<8x20xbf16>, vector<20x128xbf16>, vector<8x128xf32> -> vector<8x128xf32>
    %c0_4 = arith.constant 0 : index
    %c0_5 = arith.constant 0 : index
    %4 = vector.load %arg4[%c0_4, %c0_5] : memref<8x1xf32, #tpu.memory_space<vmem>>, vector<8x1xf32>
    %5 = vector.broadcast %4 : vector<8x1xf32> to vector<8x128xf32>
    %6 = arith.mulf %3, %5 : vector<8x128xf32>
    %c0_6 = arith.constant 0 : index
    %c0_7 = arith.constant 0 : index
    %7 = vector.load %arg5[%c0_6, %c0_7] : memref<8x1xf32, #tpu.memory_space<vmem>>, vector<8x1xf32>
    %8 = vector.broadcast %7 : vector<8x1xf32> to vector<8x128xf32>
    %9 = arith.addf %6, %8 : vector<8x128xf32>
    %cst_8 = arith.constant 0.000000e+00 : f32
    %10 = vector.broadcast %cst_8 : f32 to vector<8x128xf32>
    %11 = arith.cmpf ogt, %9, %10 : vector<8x128xf32>
    %cst_9 = arith.constant 2.000000e-01 : f32
    %12 = vector.broadcast %cst_9 : f32 to vector<8x128xf32>
    %13 = arith.mulf %12, %9 : vector<8x128xf32>
    %14 = arith.select %11, %9, %13 : vector<8x128xi1>, vector<8x128xf32>
    %15 = arith.truncf %14 : vector<8x128xf32> to vector<8x128xbf16>
    %c0_10 = arith.constant 0 : index
    %c0_11 = arith.constant 0 : index
    %c0_12 = arith.constant 0 : index
    %16 = vector.load %arg6[%c0_10, %c0_11, %c0_12] : memref<1x8x128xbf16, #tpu.memory_space<vmem>>, vector<1x8x128xbf16>
    %17 = vector.shape_cast %16 : vector<1x8x128xbf16> to vector<8x128xbf16>
    %18 = vector.shape_cast %15 : vector<8x128xbf16> to vector<1x8x128xbf16>
    tpu.vector_store %arg6[%c0_10, %c0_11, %c0_12], %18 {strides = array<i32>} : memref<1x8x128xbf16, #tpu.memory_space<vmem>>, vector<1x8x128xbf16>,
    return
  }
  func.func @transform_0(%arg0: i32, %arg1: i32) -> (i32, i32, i32) {
    %c0_i32 = arith.constant 0 : i32
    %c0_i32_0 = arith.constant 0 : i32
    return %arg0, %c0_i32, %arg1 : i32, i32, i32
  }
  func.func @transform_1(%arg0: i32, %arg1: i32) -> (i32, i32) {
    %c0_i32 = arith.constant 0 : i32
    %c0_i32_0 = arith.constant 0 : i32
    %c0_i32_1 = arith.constant 0 : i32
    return %c0_i32, %c0_i32_0 : i32, i32
  }
  func.func @transform_2(%arg0: i32, %arg1: i32) -> (i32, i32) {
    %c0_i32 = arith.constant 0 : i32
    %c0_i32_0 = arith.constant 0 : i32
    %c0_i32_1 = arith.constant 0 : i32
    return %c0_i32, %c0_i32_0 : i32, i32
  }
  func.func @transform_3(%arg0: i32, %arg1: i32) -> (i32, i32) {
    %c0_i32 = arith.constant 0 : i32
    %c0_i32_0 = arith.constant 0 : i32
    %c0_i32_1 = arith.constant 0 : i32
    return %c0_i32, %c0_i32_0 : i32, i32
  }
  func.func @transform_4(%arg0: i32, %arg1: i32) -> (i32, i32, i32) {
    %c0_i32 = arith.constant 0 : i32
    %c0_i32_0 = arith.constant 0 : i32
    return %arg0, %c0_i32, %arg1 : i32, i32, i32
  }
}

</mosaic_0001>

<bundles_post_ra>
// kernel: conv2d_block.1
= control target key start
LH: loop header
LB: loop body
LE: loop exit
PB: predicated region body
PF: predicated region fallthrough
CT: control target
= control target key end

     0   :  { %s491_s15 = smov 0   ;;  %s493_s16 = smov 0   ;;  %s537_s0 = inlined_call_operand.vmem [shape: bf16[2,20,128], index: 0, kind: input, shape index: {}]   ;;  %s538_s1 = inlined_call_operand.vmem [shape: bf16[8,20], index: 1, kind: input, shape index: {}]   ;;  %s539_s2 = inlined_call_operand.vmem [shape: f32[8,1], index: 2, kind: input, shape index: {}]   ;;  %s540_s3 = inlined_call_operand.vmem [shape: f32[8,1], index: 3, kind: input, shape index: {}]   ;;  %s541_s4 = inlined_call_operand.vmem [shape: bf16[2,8,128], index: 4, kind: output, shape index: {}]  }
   0x1   :  { %s495_s17 = smov 0  }
   0x2 LB: > { %s26_s18 = sadd.s32 1, %s457_s16  ;;  %p389_p0 = scmp.ge.s32.totalorder %s461_s17, 1  ;;  %s461_s17 = sphi %s495_s17, %s14_s17   ;;  %s457_s16 = sphi %s493_s16, %s543_s16   ;;  %s453_s15 = sphi %s491_s15, %s542_s15  }
   0x3   : > { %p28_p1 = scmp.ge.s32.totalorder %s26_s18, 2  ;;  %p181_p2 = scmp.lt.s32.totalorder %s461_s17, 3 }
   0x5   : > { %s545_s18 = smov (%p28_p1, %s26_s18), 0  ;;  %p182_p3 = pnand %p389_p0, %p181_p2 }
   0x6   : > { %p212_p4 = scmp.lt.s32.totalorder (!%p182_p3), %s453_s15, 1 }
   0x7   : > { %185 = sbr.rel (%p182_p3) target bundleno = 228 (0xe4), region = 36 }
   0xc   : > { %v463_v0 = vmov 0.0   ;;  %vm464_vm0 = vmmov 0   ;;  %v289_v1 = vld [vmem:[%s539_s2] sm:$0xff]  ;;  %s547_s15 = smov (!%p212_p4, %s453_s15), 1  ;;  %v465_v2 = vmov 0   ;;  %vm245_vm1 = vcmask 1041408  }
   0xd   : > { %400 = vmatprep.subr.bf16.mxu0 %v463_v0  ;;  %404 = vmatprep.mubr.msk.bf16.mxu0 %vm464_vm0, %v463_v0  ;;  %s408_s21 = smul.u32 12, %s547_s15  ;;  %v296_v3 = vld [vmem:[%s540_s3] sm:$0xff]  ;;  %vm241_vm2 = vcmask 162816   ;;  %s391_s29 = sshll.u32 %s547_s15, 2 }
   0xe   : > { %436 = vset.pattern.permute.xlu0 %v465_v2  ;;  %v228_v7 = vld [vmem:[%s538_s1] sm:$0xf]  ;;  %s226_s6 = scalar_lea.vmem %s541_s4, %s391_s29 }
   0xf   : > { %292 = vperm.xlu0 %436, %v289_v1   ;;  %s219_s26 = scalar_lea.vmem %s537_s0, %s408_s21 }
  0x10   : > { %v437_v4 = vld [vmem:[%s219_s26 + $0x8] ss:$0 sps:$4 sm:$0x33]   ;;  %v438_v6 = vld [vmem:[%s219_s26] sm:$0xff]  }
  0x11   : > { %v247_v5 = vsel %vm245_vm1, %v437_v4, 0 }
  0x12   : > { %401 = vmatpush3.bf16.msra.mxu0 %v247_v5 }
  0x13   : > { %299 = vperm.xlu0 %436, %v296_v3   ;;  %402 = vmatprep.subr.bf16.mxu0 %v463_v0 }
  0x16   : > { %403 = vmatpush3.bf16.msra.mxu0 %v438_v6 }
  0x19   : > { %405 = vmatmul.mubr.msk.bf16.vlgmr.msra.gmra.mxu0 %vm241_vm2, %v228_v7 }
  0x8a   : > { %v293_v8 = vpop.permute.xlu0 %292 }
  0x8e   : > { %v300_v11 = vpop.permute.xlu0 %299 }
  0xd9   : > { %v283_v9 = vpop.f32.mrf.mxu0 }
  0xda   : > { %v295_v10 = vmul.f32 %v293_v8, %v283_v9 }
  0xdb   : > { %v406_v12 = vpop.f32.mrf.mxu0 }
  0xdc   : > { %v302_v13 = vadd.f32 %v300_v11, %v295_v10 }
  0xdd   : > { %v286_v14 = vpop.f32.mrf.mxu0 }
  0xde   : > { %vm303_vm3 = vcmp.gt.f32.partialorder %v302_v13, 0.0  ;;  %v304_v15 = vmul.f32 0.2, %v302_v13 }
  0xdf   : > { %v407_v16 = vpop.f32.mrf.mxu0 }
  0xe0   : > { %v305_v17 = vsel %vm303_vm3, %v302_v13, %v304_v15 }
  0xe1   : > { %v306_v18 = vpack.c.bf16 %v305_v17, %v305_v17 }
  0xe3   : > { %307 = vst [vmem:[%s226_s6] sm:$0xf] %v306_v18 }
  0xe4 PF: > { %s14_s17 = sadd.s32 1, %s461_s17   ;;  %s542_s15 = smov %s457_s16 }
  0xe5   : > { %p11_p5 = scmp.ge.s32.totalorder %s14_s17, 4   ;;  %s543_s16 = smov %s545_s18 }
  0xe7   :  { %13 = sbr.rel (!%p11_p5) target bundleno = 2 (0x2), region = 66 }

</bundles_post_ra>
